<compile_context>
chip_gen: v7x
topology: tpu7x:2x2x1
jax: 0.10.0
libtpu: 0.0.40
codegen_flags: <defaults>
</compile_context>

<pallas_src>
import functools

import jax
import jax.numpy as jnp
from jax.experimental import pallas as pl
from jax.experimental.pallas import tpu as pltpu


def _round_up(n: int, m: int) -> int:
    return ((n + m - 1) // m) * m


def make_actor_kernel(max_action: float):
    def actor_kernel(x_ref, w1_ref, b1_ref, w2_ref, b2_ref, w3_ref, b3_ref,
                     out_ref):
        # x arrives f32 [tb, S]; cast to bf16 on the VPU (hides under MXU work).
        x = x_ref[...].astype(jnp.bfloat16)

        # Layer 1: Linear + ReLU. bf16 operands on the MXU, f32 accumulate.
        h1 = jnp.dot(x, w1_ref[...],
                     preferred_element_type=jnp.float32) + b1_ref[...]
        h1 = jnp.maximum(h1, 0.0)

        # Layer 2: Linear + ReLU (activations kept f32; cast only the dot operand).
        h2 = jnp.dot(h1.astype(w2_ref.dtype), w2_ref[...],
                     preferred_element_type=jnp.float32) + b2_ref[...]
        h2 = jnp.maximum(h2, 0.0)

        # Layer 3: Linear + max_action * tanh; bf16 store (lane-dense writeback).
        a = jnp.dot(h2.astype(w3_ref.dtype), w3_ref[...],
                    preferred_element_type=jnp.float32) + b3_ref[...]
        out_ref[...] = (max_action * jnp.tanh(a)).astype(out_ref.dtype)

    return actor_kernel


def prepare_actor_params(params, states_dim: int, actions_dim: int):
    """Pad parameters to lane-aligned output widths and cast weights to bf16.

    Inputs (f32, weights stored [in, out]):
      w1 [S,400] b1 [1,400]  w2 [400,300] b2 [1,300]  w3 [300,A] b3 [1,A]
    w1's input dim is left at the true S (x is not feature-padded).  Zero
    padding preserves the exact math: zero weight rows/cols contribute
    nothing and padded bias entries are 0 so relu(0)=0 / tanh(0)=0.
    """
    h1_pad = _round_up(400, 128)      # 512
    h2_pad = _round_up(300, 128)      # 384
    a_pad = _round_up(actions_dim, 128)

    def pad_to(x, shape):
        return jnp.pad(x, [(0, t - c) for c, t in zip(x.shape, shape)])

    return {
        "w1": pad_to(params["w1"], (states_dim, h1_pad)).astype(jnp.bfloat16),
        "b1": pad_to(params["b1"], (1, h1_pad)).astype(jnp.float32),
        "w2": pad_to(params["w2"], (h1_pad, h2_pad)).astype(jnp.bfloat16),
        "b2": pad_to(params["b2"], (1, h2_pad)).astype(jnp.float32),
        "w3": pad_to(params["w3"], (h2_pad, a_pad)).astype(jnp.bfloat16),
        "b3": pad_to(params["b3"], (1, a_pad)).astype(jnp.float32),
    }


@functools.partial(jax.jit,
                   static_argnames=("actions_dim", "max_action", "block_b"))
def actor_forward(x, prepped, actions_dim: int, max_action: float,
                  block_b: int = 1024):
    """x: [B, states_dim] f32; prepped: output of prepare_actor_params.

    Returns [B, actions_dim] bf16 actions.
    """
    B, S = x.shape
    h1_pad = prepped["w1"].shape[1]
    h2_pad = prepped["w2"].shape[1]
    a_pad = prepped["w3"].shape[1]

    # Batch tile: multiple of 8 sublanes. Large batches use multiples of 256
    # (full MXU M-dim) capped at ~half the batch so the grid has >= 2 steps
    # and "parallel" can shard across v7x's two TensorCores.
    if B <= 256:
        tb = _round_up(B, 8)
    else:
        tb = min(block_b, _round_up(pl.cdiv(B, 2), 256))
    b_pad = _round_up(B, tb)

    # Pad only the batch (sublane) dim when needed; features stay unpadded f32.
    x_p = x if b_pad == B else jnp.pad(x, ((0, b_pad - B), (0, 0)))

    grid = (b_pad // tb,)
    resident = lambda i: (0, 0)  # same block index every step => stays in VMEM

    weight_bytes = sum(int(v.size) * v.dtype.itemsize for v in prepped.values())
    cost = pl.CostEstimate(
        flops=2 * b_pad * (S * h1_pad + h1_pad * h2_pad + h2_pad * a_pad),
        transcendentals=b_pad * a_pad,
        bytes_accessed=b_pad * S * 4 + b_pad * a_pad * 2 + weight_bytes,
    )

    out = pl.pallas_call(
        make_actor_kernel(max_action),
        out_shape=jax.ShapeDtypeStruct((b_pad, a_pad), jnp.bfloat16),
        grid=grid,
        in_specs=[
            pl.BlockSpec((tb, S), lambda i: (i, 0)),    # x tile (f32, true S)
            pl.BlockSpec((S, h1_pad), resident),        # w1
            pl.BlockSpec((1, h1_pad), resident),        # b1
            pl.BlockSpec((h1_pad, h2_pad), resident),   # w2
            pl.BlockSpec((1, h2_pad), resident),        # b2
            pl.BlockSpec((h2_pad, a_pad), resident),    # w3
            pl.BlockSpec((1, a_pad), resident),         # b3
        ],
        out_specs=pl.BlockSpec((tb, a_pad), lambda i: (i, 0)),
        compiler_params=pltpu.CompilerParams(
            dimension_semantics=("parallel",),
            vmem_limit_bytes=32 * 1024 * 1024,
        ),
        cost_estimate=cost,
    )(x_p, prepped["w1"], prepped["b1"], prepped["w2"], prepped["b2"],
      prepped["w3"], prepped["b3"])

    # Slice away padded batch rows and padded action lanes for the caller.
    return out[:B, :actions_dim]


def init_actor_params(key, states_dim: int, actions_dim: int):
    """nn.Linear-style init (uniform +-1/sqrt(fan_in)); weights stored [in, out]."""
    dims = [(states_dim, 400), (400, 300), (300, actions_dim)]
    params = {}
    for i, (fan_in, fan_out) in enumerate(dims, start=1):
        key, kw, kb = jax.random.split(key, 3)
        bound = 1.0 / jnp.sqrt(jnp.float32(fan_in))
        params[f"w{i}"] = jax.random.uniform(
            kw, (fan_in, fan_out), jnp.float32, minval=-bound, maxval=bound)
        params[f"b{i}"] = jax.random.uniform(
            kb, (1, fan_out), jnp.float32, minval=-bound, maxval=bound)
    return params


def actor_ref(x, params, max_action):
    """Pure-JAX f32 reference of the PyTorch forward for verification."""
    h1 = jnp.maximum(x @ params["w1"] + params["b1"], 0.0)
    h2 = jnp.maximum(h1 @ params["w2"] + params["b2"], 0.0)
    return max_action * jnp.tanh(h2 @ params["w3"] + params["b3"])


if __name__ == "__main__":
    STATES_DIM = 16
    ACTIONS_DIM = 8
    MAX_ACTION = 2.0
    BATCH = 2

    key = jax.random.PRNGKey(0)
    key, kx = jax.random.split(key)
    x = jax.random.normal(kx, (BATCH, STATES_DIM), dtype=jnp.float32)
    params = init_actor_params(key, STATES_DIM, ACTIONS_DIM)

    prepped = prepare_actor_params(params, STATES_DIM, ACTIONS_DIM)
    out = actor_forward(x, prepped, ACTIONS_DIM, MAX_ACTION)
    out = jax.block_until_ready(out)

    ref = actor_ref(x, params, MAX_ACTION)
    assert out.shape == (BATCH, ACTIONS_DIM)
    # bf16 MXU operands + bf16 output -> looser tolerance than pure-f32.
    assert jnp.allclose(out.astype(jnp.float32), ref, atol=5e-2, rtol=5e-2), (
        float(jnp.max(jnp.abs(out.astype(jnp.float32) - ref))))

    print("KERNEL_OK")
</pallas_src>

<mosaic_0001>
module attributes {stable_mosaic.version = 11 : i64} {
  func.func @actor_kernel(%arg0: i32, %arg1: memref<8x16xf32, #tpu.memory_space<vmem>>, %arg2: memref<16x512xbf16, #tpu.memory_space<vmem>>, %arg3: memref<1x512xf32, #tpu.memory_space<vmem>>, %arg4: memref<512x384xbf16, #tpu.memory_space<vmem>>, %arg5: memref<1x384xf32, #tpu.memory_space<vmem>>, %arg6: memref<384x128xbf16, #tpu.memory_space<vmem>>, %arg7: memref<1x128xf32, #tpu.memory_space<vmem>>, %arg8: memref<8x128xbf16, #tpu.memory_space<vmem>>) attributes {dimension_semantics = [#tpu.dimension_semantics<parallel>], iteration_bounds = array<i64: 1>, scalar_prefetch = 0 : i64, scratch_operands = 0 : i64, tpu.core_type = #tpu.core_type<tc>, window_params = [{transform_indices = @transform_0, window_bounds = array<i64: 8, 16>}, {pipeline_mode = #tpu.pipeline_mode<synchronous>, transform_indices = @transform_1, window_bounds = array<i64: 16, 512>}, {pipeline_mode = #tpu.pipeline_mode<synchronous>, transform_indices = @transform_2, window_bounds = array<i64: 1, 512>}, {pipeline_mode = #tpu.pipeline_mode<synchronous>, transform_indices = @transform_3, window_bounds = array<i64: 512, 384>}, {pipeline_mode = #tpu.pipeline_mode<synchronous>, transform_indices = @transform_4, window_bounds = array<i64: 1, 384>}, {pipeline_mode = #tpu.pipeline_mode<synchronous>, transform_indices = @transform_5, window_bounds = array<i64: 384, 128>}, {pipeline_mode = #tpu.pipeline_mode<synchronous>, transform_indices = @transform_6, window_bounds = array<i64: 1, 128>}, {transform_indices = @transform_7, window_bounds = array<i64: 8, 128>}]} {
    %c0 = arith.constant 0 : index
    %c0_0 = arith.constant 0 : index
    %0 = vector.load %arg1[%c0, %c0_0] : memref<8x16xf32, #tpu.memory_space<vmem>>, vector<8x16xf32>
    %1 = arith.truncf %0 : vector<8x16xf32> to vector<8x16xbf16>
    %c0_1 = arith.constant 0 : index
    %c0_2 = arith.constant 0 : index
    %2 = vector.load %arg2[%c0_1, %c0_2] : memref<16x512xbf16, #tpu.memory_space<vmem>>, vector<16x512xbf16>
    %cst = arith.constant dense<0.000000e+00> : vector<8x512xf32>
    %3 = tpu.matmul %1, %2, %cst {dimension_numbers = #tpu.dot_dimension_numbers<[1], [0], [0], [1], [0, 0, 1, 1], [], []>} : vector<8x16xbf16>, vector<16x512xbf16>, vector<8x512xf32> -> vector<8x512xf32>
    %c0_3 = arith.constant 0 : index
    %c0_4 = arith.constant 0 : index
    %4 = vector.load %arg3[%c0_3, %c0_4] : memref<1x512xf32, #tpu.memory_space<vmem>>, vector<1x512xf32>
    %5 = vector.broadcast %4 : vector<1x512xf32> to vector<8x512xf32>
    %6 = arith.addf %3, %5 : vector<8x512xf32>
    %cst_5 = arith.constant 0.000000e+00 : f32
    %7 = vector.broadcast %cst_5 : f32 to vector<8x512xf32>
    %8 = arith.maximumf %6, %7 : vector<8x512xf32>
    %9 = arith.truncf %8 : vector<8x512xf32> to vector<8x512xbf16>
    %c0_6 = arith.constant 0 : index
    %c0_7 = arith.constant 0 : index
    %10 = vector.load %arg4[%c0_6, %c0_7] : memref<512x384xbf16, #tpu.memory_space<vmem>>, vector<512x384xbf16>
    %cst_8 = arith.constant dense<0.000000e+00> : vector<8x384xf32>
    %11 = tpu.matmul %9, %10, %cst_8 {dimension_numbers = #tpu.dot_dimension_numbers<[1], [0], [0], [1], [0, 0, 1, 1], [], []>} : vector<8x512xbf16>, vector<512x384xbf16>, vector<8x384xf32> -> vector<8x384xf32>
    %c0_9 = arith.constant 0 : index
    %c0_10 = arith.constant 0 : index
    %12 = vector.load %arg5[%c0_9, %c0_10] : memref<1x384xf32, #tpu.memory_space<vmem>>, vector<1x384xf32>
    %13 = vector.broadcast %12 : vector<1x384xf32> to vector<8x384xf32>
    %14 = arith.addf %11, %13 : vector<8x384xf32>
    %cst_11 = arith.constant 0.000000e+00 : f32
    %15 = vector.broadcast %cst_11 : f32 to vector<8x384xf32>
    %16 = arith.maximumf %14, %15 : vector<8x384xf32>
    %17 = arith.truncf %16 : vector<8x384xf32> to vector<8x384xbf16>
    %c0_12 = arith.constant 0 : index
    %c0_13 = arith.constant 0 : index
    %18 = vector.load %arg6[%c0_12, %c0_13] : memref<384x128xbf16, #tpu.memory_space<vmem>>, vector<384x128xbf16>
    %cst_14 = arith.constant dense<0.000000e+00> : vector<8x128xf32>
    %19 = tpu.matmul %17, %18, %cst_14 {dimension_numbers = #tpu.dot_dimension_numbers<[1], [0], [0], [1], [0, 0, 1, 1], [], []>} : vector<8x384xbf16>, vector<384x128xbf16>, vector<8x128xf32> -> vector<8x128xf32>
    %c0_15 = arith.constant 0 : index
    %c0_16 = arith.constant 0 : index
    %20 = vector.load %arg7[%c0_15, %c0_16] : memref<1x128xf32, #tpu.memory_space<vmem>>, vector<1x128xf32>
    %21 = vector.broadcast %20 : vector<1x128xf32> to vector<8x128xf32>
    %22 = arith.addf %19, %21 : vector<8x128xf32>
    %23 = math.tanh %22 : vector<8x128xf32>
    %cst_17 = arith.constant 2.000000e+00 : f32
    %24 = vector.broadcast %cst_17 : f32 to vector<8x128xf32>
    %25 = arith.mulf %24, %23 : vector<8x128xf32>
    %26 = arith.truncf %25 : vector<8x128xf32> to vector<8x128xbf16>
    %c0_18 = arith.constant 0 : index
    %c0_19 = arith.constant 0 : index
    %27 = vector.load %arg8[%c0_18, %c0_19] : memref<8x128xbf16, #tpu.memory_space<vmem>>, vector<8x128xbf16>
    tpu.vector_store %arg8[%c0_18, %c0_19], %26 {strides = array<i32>} : memref<8x128xbf16, #tpu.memory_space<vmem>>, vector<8x128xbf16>,
    return
  }
  func.func @transform_0(%arg0: i32) -> (i32, i32) {
    %c0_i32 = arith.constant 0 : i32
    %c0_i32_0 = arith.constant 0 : i32
    return %arg0, %c0_i32 : i32, i32
  }
  func.func @transform_1(%arg0: i32) -> (i32, i32) {
    %c0_i32 = arith.constant 0 : i32
    %c0_i32_0 = arith.constant 0 : i32
    %c0_i32_1 = arith.constant 0 : i32
    return %c0_i32, %c0_i32_0 : i32, i32
  }
  func.func @transform_2(%arg0: i32) -> (i32, i32) {
    %c0_i32 = arith.constant 0 : i32
    %c0_i32_0 = arith.constant 0 : i32
    %c0_i32_1 = arith.constant 0 : i32
    return %c0_i32, %c0_i32_0 : i32, i32
  }
  func.func @transform_3(%arg0: i32) -> (i32, i32) {
    %c0_i32 = arith.constant 0 : i32
    %c0_i32_0 = arith.constant 0 : i32
    %c0_i32_1 = arith.constant 0 : i32
    return %c0_i32, %c0_i32_0 : i32, i32
  }
  func.func @transform_4(%arg0: i32) -> (i32, i32) {
    %c0_i32 = arith.constant 0 : i32
    %c0_i32_0 = arith.constant 0 : i32
    %c0_i32_1 = arith.constant 0 : i32
    return %c0_i32, %c0_i32_0 : i32, i32
  }
  func.func @transform_5(%arg0: i32) -> (i32, i32) {
    %c0_i32 = arith.constant 0 : i32
    %c0_i32_0 = arith.constant 0 : i32
    %c0_i32_1 = arith.constant 0 : i32
    return %c0_i32, %c0_i32_0 : i32, i32
  }
  func.func @transform_6(%arg0: i32) -> (i32, i32) {
    %c0_i32 = arith.constant 0 : i32
    %c0_i32_0 = arith.constant 0 : i32
    %c0_i32_1 = arith.constant 0 : i32
    return %c0_i32, %c0_i32_0 : i32, i32
  }
  func.func @transform_7(%arg0: i32) -> (i32, i32) {
    %c0_i32 = arith.constant 0 : i32
    %c0_i32_0 = arith.constant 0 : i32
    return %arg0, %c0_i32 : i32, i32
  }
}

</mosaic_0001>

<bundles_post_ra>
// kernel: actor_forward.1
= control target key start
LH: loop header
LB: loop body
LE: loop exit
PB: predicated region body
PF: predicated region fallthrough
CT: control target
= control target key end

     0   :  { %12 = vsyncpa [#allocation3], 0  ;;  %s1924_s0 = inlined_call_operand.vmem [shape: f32[8,16], index: 0, kind: input, shape index: {}]   ;;  %s1925_s1 = inlined_call_operand.hbm [shape: bf16[16,512], index: 1, kind: input, shape index: {}]   ;;  %s1926_s2 = inlined_call_operand.vmem [shape: f32[1,512], index: 2, kind: input, shape index: {}]   ;;  %s1927_s3 = inlined_call_operand.hbm [shape: bf16[512,384], index: 3, kind: input, shape index: {}]   ;;  %s1928_s4 = inlined_call_operand.vmem [shape: f32[1,384], index: 4, kind: input, shape index: {}]   ;;  %s1929_s5 = inlined_call_operand.hbm [shape: bf16[384,128], index: 5, kind: input, shape index: {}]   ;;  %s1930_s6 = inlined_call_operand.vmem [shape: f32[1,128], index: 6, kind: input, shape index: {}]   ;;  %s1931_s7 = inlined_call_operand.vmem [shape: bf16[8,128], index: 7, kind: output, shape index: {}]  }
   0x1   :  { %13 = vsyncpa [#allocation5], 0  ;;  %s1794_s24 = smov [#allocation4]   ;;  %s1724_s28 = scalar_lea.hbm %s1927_s3, 12288 }
   0x2   :  { %s35_s25 = sshll.u32 %s1794_s24, 4  ;;  %p1725_p0 = scmp.ne.s32.totalorder %s1927_s3, %s1724_s28  ;;  %s36_s25 = int_to_ptr.vmem [resolvable:$true] %s35_s25 }
   0x3   :  { %p1728_p1 = scmp.lt.u32.totalorder %s1724_s28, %s1927_s3 }
   0x5   :  { %p1730_p2 = pnand %p1728_p1, %p1725_p0 }
   0x7   :  { %1733 = shalt.err (!%p1730_p2)
}
   0x8   :  { %s1734_s10 = scalar_lea.vmem %s36_s25, 12288  ;;  %p1739_p4 = scmp.lt.s32.totalorder %s36_s25, %s36_s25 }
   0x9   :  { %p1735_p3 = scmp.ne.s32.totalorder %s36_s25, %s1734_s10  ;;  %p1740_p5 = scmp.lt.s32.totalorder %s1734_s10, %s1734_s10 }
   0xb   :  { %p1741_p6 = por %p1740_p5, %p1739_p4 }
   0xd   :  { %p1742_p7 = pnand %p1741_p6, %p1735_p3 }
   0xf   :  { %1745 = shalt.err (!%p1742_p7)
}
  0x10   :  { %s1795_s11 = smov 192   ;;  %s1796_s12 = smov 12  }
  0x11   :  { %41 = dma.hbm_to_vmem [thread:$0]  %s1927_s3, 12288, %s36_s25, [#allocation5], %s1795_s11, %s1795_s11, %s1796_s12  }
  0x12   :  { %s1797_s15 = smov [#allocation2]   ;;  %s1746_s19 = scalar_lea.hbm %s1925_s1, 512 }
  0x13   :  { %s21_s16 = sshll.u32 %s1797_s15, 4  ;;  %p1747_p8 = scmp.ne.s32.totalorder %s1925_s1, %s1746_s19  ;;  %s22_s16 = int_to_ptr.vmem [resolvable:$true] %s21_s16 }
  0x14   :  { %p1750_p9 = scmp.lt.u32.totalorder %s1746_s19, %s1925_s1 }
  0x16   :  { %p1752_p10 = pnand %p1750_p9, %p1747_p8 }
  0x18   :  { %1755 = shalt.err (!%p1752_p10)
}
  0x19   :  { %s1756_s24 = scalar_lea.vmem %s22_s16, 512  ;;  %p1761_p12 = scmp.lt.s32.totalorder %s22_s16, %s22_s16 }
  0x1a   :  { %p1757_p11 = scmp.ne.s32.totalorder %s22_s16, %s1756_s24  ;;  %p1762_p13 = scmp.lt.s32.totalorder %s1756_s24, %s1756_s24 }
  0x1c   :  { %p1763_p0 = por %p1762_p13, %p1761_p12 }
  0x1e   :  { %p1764_p1 = pnand %p1763_p0, %p1757_p11 }
  0x20   :  { %1767 = shalt.err (!%p1764_p1)
}
  0x21   :  { %s1798_s3 = smov 256   ;;  %s1799_s25 = smov 16  }
  0x22   :  { %27 = dma.hbm_to_vmem [thread:$0]  %s1925_s1, 512, %s22_s16, [#allocation3], %s1798_s3, %s1798_s3, %s1799_s25  }
  0x23   :  { %s1800_s28 = smov [#allocation6]   ;;  %s1768_s9 = scalar_lea.hbm %s1929_s5, 3072 }
  0x24   :  { %s49_s29 = sshll.u32 %s1800_s28, 4  ;;  %p1769_p2 = scmp.ne.s32.totalorder %s1929_s5, %s1768_s9  ;;  %s50_s29 = int_to_ptr.vmem [resolvable:$true] %s49_s29 }
  0x25   :  { %p1772_p3 = scmp.lt.u32.totalorder %s1768_s9, %s1929_s5 }
  0x27   :  { %p1774_p4 = pnand %p1772_p3, %p1769_p2 }
  0x29   :  { %1777 = shalt.err (!%p1774_p4)
}
  0x2a   :  { %s1778_s14 = scalar_lea.vmem %s50_s29, 3072  ;;  %p1783_p6 = scmp.lt.s32.totalorder %s50_s29, %s50_s29 }
  0x2b   :  { %p1779_p5 = scmp.ne.s32.totalorder %s50_s29, %s1778_s14  ;;  %p1784_p7 = scmp.lt.s32.totalorder %s1778_s14, %s1778_s14 }
  0x2d   :  { %p1785_p8 = por %p1784_p7, %p1783_p6 }
  0x2f   :  { %p1786_p9 = pnand %p1785_p8, %p1779_p5 }
  0x31   :  { %1789 = shalt.err (!%p1786_p9)
}
  0x32   :  { %s1801_s1 = smov 64   ;;  %s1802_s15 = smov 4  }
  0x33   :  { %55 = dma.hbm_to_vmem [thread:$0]  %s1929_s5, 3072, %s50_s29, [#allocation5], %s1801_s1, %s1801_s1, %s1802_s15  }
  0x34   :  { %1790 = dma.done.wait [#allocation3], 512  }
  0x35   :  { %1791 = vsyncadd [#allocation3], 4294966784 }
  0x36   :  { %1792 = dma.done.wait [#allocation5], 15360  }
  0x37   :  { %1793 = vsyncadd [#allocation5], 4294951936  ;;  %v1803_v0 = vmov 0   ;;  %v1564_v1 = vld [vmem:[#allocation2 + $0x4] ss:$16 sps:$4 sm:$0xff]   ;;  %vm116_vm0 = vcmask 130048   ;;  %v76_v57 = vlaneseq }
  0x38   :  { %152 = vmatprep.mubr.bf16.mxu0 %v1803_v0  ;;  %193 = vmatprep.mubr.bf16.mxu1 %v1803_v0  ;;  %v1566_v2 = vld [vmem:[#allocation2] ss:$16 sps:$4 sm:$0xff]   ;;  %v1567_v5 = vld [vmem:[#allocation2 + $0xc] ss:$16 sps:$4 sm:$0xff]   ;;  %v1569_v6 = vld [vmem:[#allocation2 + $0x8] ss:$16 sps:$4 sm:$0xff]  }
  0x39   :  { %v68_v3 = vld [vmem:[%s1924_s0] sm:$0xff]  ;;  %120 = vmatprep.subr.bf16.mxu0 %v1564_v1  ;;  %161 = vmatprep.subr.bf16.mxu1 %v1567_v5  ;;  %v1575_v9 = vld [vmem:[#allocation4 + $0x1c] ss:$12 sps:$4 sm:$0xff]   ;;  %v1581_v13 = vld [vmem:[#allocation4 + $0x4c] ss:$12 sps:$4 sm:$0xff]   ;;  %v1885_v58 = vshrl.u32 %v76_v57, 7 }
  0x3a   :  { %v69_v4 = vpack.c.bf16 %v68_v3, %v68_v3  ;;  %121 = vmatpush1.bf16.msra.mxu0 %v1566_v2  ;;  %v1570_v7 = vld [vmem:[#allocation4] ss:$12 sps:$4 sm:$0xff]   ;;  %v1572_v8 = vld [vmem:[#allocation4 + $0x4] ss:$12 sps:$4 sm:$0xff]   ;;  %162 = vmatpush1.bf16.msra.mxu1 %v1569_v6  ;;  %v1579_v14 = vld [vmem:[#allocation4 + $0x48] ss:$12 sps:$4 sm:$0xff]  }
  0x3b   :  { %867 = vmatprep.subr.bf16.mxu0 %v1572_v8  ;;  %v1573_v10 = vld [vmem:[#allocation4 + $0x18] ss:$12 sps:$4 sm:$0xff]   ;;  %v1578_v11 = vld [vmem:[#allocation4 + $0x34] ss:$12 sps:$4 sm:$0xff]   ;;  %v1576_v12 = vld [vmem:[#allocation4 + $0x30] ss:$12 sps:$4 sm:$0xff]  }
  0x3c   :  { %v1584_v15 = vld [vmem:[#allocation4 + $0x64] ss:$12 sps:$4 sm:$0xff]   ;;  %v1597_v16 = vld [vmem:[#allocation4 + $0xc8] ss:$12 sps:$4 sm:$0xff]   ;;  %v1582_v18 = vld [vmem:[#allocation4 + $0x60] ss:$12 sps:$4 sm:$0xff]  }
  0x3d   :  { %1328 = vmatmul.mubr.msk.bf16.vlgmr.msra.gmra.mrb[0].mxu0 %vm116_vm0, %v69_v4  ;;  %1329 = vmatmul.mubr.msk.bf16.vlgmr.msra.gmra.mrb[0].mxu1 %vm116_vm0, %v69_v4  ;;  %v1598_v17 = vld [vmem:[#allocation4 + $0x8] ss:$12 sps:$4 sm:$0xff]   ;;  %v1602_v20 = vld [vmem:[#allocation4 + $0xe0] ss:$12 sps:$4 sm:$0xff]   ;;  %v1585_v22 = vld [vmem:[#allocation4 + $0x78] ss:$12 sps:$4 sm:$0xff]  }
  0x3e   :  { %868 = vmatpush1.bf16.msra.mxu0 %v1570_v7  ;;  %1451 = vmatprep.subr.bf16.mxu1 %v1597_v16  ;;  %v1587_v19 = vld [vmem:[#allocation4 + $0x7c] ss:$12 sps:$4 sm:$0xff]   ;;  %v1603_v21 = vld [vmem:[#allocation4 + $0x20] ss:$12 sps:$4 sm:$0xff]   ;;  %v1607_v23 = vld [vmem:[#allocation4 + $0xf8] ss:$12 sps:$4 sm:$0xff]  }
  0x3f   :  { %869 = vmatprep.subr.bf16.mxu0 %v1575_v9  ;;  %1452 = vmatpush3.bf16.msra.mxu1 %v1598_v17  ;;  %v1608_v24 = vld [vmem:[#allocation4 + $0x38] ss:$12 sps:$4 sm:$0xff]   ;;  %v1590_v25 = vld [vmem:[#allocation4 + $0x94] ss:$12 sps:$4 sm:$0xff]   ;;  %v1612_v26 = vld [vmem:[#allocation4 + $0x110] ss:$12 sps:$4 sm:$0xff]  }
  0x40   :  { %1453 = vmatprep.subr.bf16.mxu1 %v1602_v20  ;;  %v1613_v27 = vld [vmem:[#allocation4 + $0x50] ss:$12 sps:$4 sm:$0xff]   ;;  %v1593_v29 = vld [vmem:[#allocation4 + $0xac] ss:$12 sps:$4 sm:$0xff]   ;;  %v1617_v30 = vld [vmem:[#allocation4 + $0x128] ss:$12 sps:$4 sm:$0xff]  }
  0x41   :  { %v1588_v28 = vld [vmem:[#allocation4 + $0x90] ss:$12 sps:$4 sm:$0xff]   ;;  %v1618_v31 = vld [vmem:[#allocation4 + $0x68] ss:$12 sps:$4 sm:$0xff]   ;;  %v1622_v34 = vld [vmem:[#allocation4 + $0x140] ss:$12 sps:$4 sm:$0xff]  }
  0x42   :  { %870 = vmatpush1.bf16.msra.mxu0 %v1573_v10  ;;  %v1591_v32 = vld [vmem:[#allocation4 + $0xa8] ss:$12 sps:$4 sm:$0xff]   ;;  %v1596_v33 = vld [vmem:[#allocation4 + $0xc4] ss:$12 sps:$4 sm:$0xff]   ;;  %v1594_v35 = vld [vmem:[#allocation4 + $0xc0] ss:$12 sps:$4 sm:$0xff]  }
  0x43   :  { %871 = vmatprep.subr.bf16.mxu0 %v1578_v11  ;;  %1454 = vmatpush3.bf16.msra.mxu1 %v1603_v21  ;;  %v1623_v36 = vld [vmem:[#allocation4 + $0x80] ss:$12 sps:$4 sm:$0xff]   ;;  %v1601_v37 = vld [vmem:[#allocation4 + $0xdc] ss:$12 sps:$4 sm:$0xff]   ;;  %v1599_v38 = vld [vmem:[#allocation4 + $0xd8] ss:$12 sps:$4 sm:$0xff]  }
  0x44   :  { %1455 = vmatprep.subr.bf16.mxu1 %v1607_v23  ;;  %v1606_v39 = vld [vmem:[#allocation4 + $0xf4] ss:$12 sps:$4 sm:$0xff]   ;;  %v1604_v40 = vld [vmem:[#allocation4 + $0xf0] ss:$12 sps:$4 sm:$0xff]   ;;  %v1611_v41 = vld [vmem:[#allocation4 + $0x10c] ss:$12 sps:$4 sm:$0xff]  }
  0x45   :  { %v1609_v42 = vld [vmem:[#allocation4 + $0x108] ss:$12 sps:$4 sm:$0xff]   ;;  %v1616_v43 = vld [vmem:[#allocation4 + $0x124] ss:$12 sps:$4 sm:$0xff]   ;;  %v1614_v44 = vld [vmem:[#allocation4 + $0x120] ss:$12 sps:$4 sm:$0xff]  }
  0x46   :  { %872 = vmatpush1.bf16.msra.mxu0 %v1576_v12  ;;  %v1621_v45 = vld [vmem:[#allocation4 + $0x13c] ss:$12 sps:$4 sm:$0xff]   ;;  %v1619_v46 = vld [vmem:[#allocation4 + $0x138] ss:$12 sps:$4 sm:$0xff]   ;;  %v1626_v47 = vld [vmem:[#allocation4 + $0x154] ss:$12 sps:$4 sm:$0xff]  }
  0x47   :  { %873 = vmatprep.subr.bf16.mxu0 %v1581_v13  ;;  %1456 = vmatpush3.bf16.msra.mxu1 %v1608_v24  ;;  %v1627_v48 = vld [vmem:[#allocation4 + $0x158] ss:$12 sps:$4 sm:$0xff]   ;;  %v1624_v49 = vld [vmem:[#allocation4 + $0x150] ss:$12 sps:$4 sm:$0xff]   ;;  %v1629_v53 = vld [vmem:[#allocation4 + $0x168] ss:$12 sps:$4 sm:$0xff]  }
  0x48   :  { %1457 = vmatprep.subr.bf16.mxu1 %v1612_v26  ;;  %v1628_v50 = vld [vmem:[#allocation4 + $0x98] ss:$12 sps:$4 sm:$0xff]   ;;  %v1632_v52 = vld [vmem:[#allocation4 + $0x170] ss:$12 sps:$4 sm:$0xff]   ;;  %v1637_v56 = vld [vmem:[#allocation4 + $0x248] ss:$12 sps:$4 sm:$0xff]  }
  0x49   :  { %v1631_v51 = vld [vmem:[#allocation4 + $0x16c] ss:$12 sps:$4 sm:$0xff]   ;;  %v1633_v54 = vld [vmem:[#allocation4 + $0xb0] ss:$12 sps:$4 sm:$0xff]   ;;  %v78_v59 = vsub.s32 0, %v1885_v58  ;;  %v82_v61 = vsub.s32 1, %v1885_v58 }
  0x4a   :  { %874 = vmatpush1.bf16.msra.mxu0 %v1579_v14  ;;  %v1636_v55 = vld [vmem:[#allocation4 + $0x184] ss:$12 sps:$4 sm:$0xff]   ;;  %v1891_v60 = vld [vmem:[%s1926_s2] sm:$0xf]  ;;  %v90_v62 = vsub.s32 3, %v1885_v58  ;;  %vm1805_vm1 = vmmov 0  }
  0x4b   :  { %875 = vmatprep.subr.bf16.mxu0 %v1584_v15  ;;  %1458 = vmatpush3.bf16.msra.mxu1 %v1613_v27  ;;  %v79_v63 = vrot.slane %v1891_v60, %v78_v59  ;;  %v83_v0 = vrot.slane %v1891_v60, %v82_v61  ;;  %v1634_v16 = vld [vmem:[#allocation4 + $0x180] ss:$12 sps:$4 sm:$0xff]   ;;  %v1638_v17 = vld [vmem:[#allocation4 + $0x188] ss:$12 sps:$4 sm:$0xff]   ;;  %v1639_v23 = vld [vmem:[#allocation4 + $0x198] ss:$12 sps:$4 sm:$0xff]  }
  0x4c   :  { %1459 = vmatprep.subr.bf16.mxu1 %v1617_v30  ;;  %v91_v2 = vrot.slane %v1891_v60, %v90_v62  ;;  %v1641_v20 = vld [vmem:[#allocation4 + $0x19c] ss:$12 sps:$4 sm:$0xff]   ;;  %v1642_v21 = vld [vmem:[#allocation4 + $0x260] ss:$12 sps:$4 sm:$0xff]   ;;  %v1647_v26 = vld [vmem:[#allocation4 + $0x278] ss:$12 sps:$4 sm:$0xff]  }
  0x4d   :  { %v1643_v24 = vld [vmem:[#allocation4 + $0x1a0] ss:$12 sps:$4 sm:$0xff]   ;;  %v1644_v27 = vld [vmem:[#allocation4 + $0x1b0] ss:$12 sps:$4 sm:$0xff]   ;;  %v1677_v57 = vld [vmem:[#allocation4 + $0x258] ss:$12 sps:$4 sm:$0xff]  }
  0x4e   :  { %876 = vmatpush1.bf16.msra.mxu0 %v1582_v18  ;;  %v1652_v30 = vld [vmem:[#allocation4 + $0x290] ss:$12 sps:$4 sm:$0xff]  }
  0x4f   :  { %877 = vmatprep.subr.bf16.mxu0 %v1587_v19  ;;  %1460 = vmatpush3.bf16.msra.mxu1 %v1618_v31  ;;  %v1649_v31 = vld [vmem:[#allocation4 + $0x1c8] ss:$12 sps:$4 sm:$0xff]   ;;  %v1680_v62 = vld [vmem:[#allocation4 + $0x270] ss:$12 sps:$4 sm:$0xff]  }
  0x50   :  { %1461 = vmatprep.subr.bf16.mxu1 %v1622_v34  ;;  %v1657_v34 = vld [vmem:[#allocation4 + $0x2a8] ss:$12 sps:$4 sm:$0xff]  }
  0x52   :  { %878 = vmatpush1.bf16.msra.mxu0 %v1585_v22 }
  0x53   :  { %879 = vmatprep.subr.bf16.mxu0 %v1590_v25  ;;  %1462 = vmatpush3.bf16.msra.mxu1 %v1623_v36  ;;  %v1646_v25 = vld [vmem:[#allocation4 + $0x1b4] ss:$12 sps:$4 sm:$0xff]  }
  0x54   :  { %1463 = vmatprep.subr.bf16.mxu1 %v1627_v48  ;;  %v1654_v36 = vld [vmem:[#allocation4 + $0x1e0] ss:$12 sps:$4 sm:$0xff]  }
  0x55   :  { %v1671_v48 = vld [vmem:[#allocation4 + $0x22c] ss:$12 sps:$4 sm:$0xff]  }
  0x56   :  { %880 = vmatpush1.bf16.msra.mxu0 %v1588_v28  ;;  %v1648_v28 = vld [vmem:[#allocation4 + $0x1b8] ss:$12 sps:$4 sm:$0xff]  }
  0x57   :  { %881 = vmatprep.subr.bf16.mxu0 %v1593_v29  ;;  %1464 = vmatpush3.bf16.msra.mxu1 %v1628_v50  ;;  %v1651_v29 = vld [vmem:[#allocation4 + $0x1cc] ss:$12 sps:$4 sm:$0xff]  }
  0x58   :  { %1465 = vmatprep.subr.bf16.mxu1 %v1632_v52  ;;  %v1673_v52 = vld [vmem:[#allocation4 + $0x230] ss:$12 sps:$4 sm:$0xff]  }
  0x5a   :  { %882 = vmatpush1.bf16.msra.mxu0 %v1591_v32  ;;  %v1653_v32 = vld [vmem:[#allocation4 + $0x1d0] ss:$12 sps:$4 sm:$0xff]  }
  0x5b   :  { %883 = vmatprep.subr.bf16.mxu0 %v1596_v33  ;;  %1466 = vmatpush3.bf16.msra.mxu1 %v1633_v54  ;;  %v1656_v33 = vld [vmem:[#allocation4 + $0x1e4] ss:$12 sps:$4 sm:$0xff]  }
  0x5c   :  { %1473 = vmatprep.subr.bf16.mxu1 %v1637_v56  ;;  %v1679_v56 = vld [vmem:[#allocation4 + $0x25c] ss:$12 sps:$4 sm:$0xff]  }
  0x5e   :  { %884 = vmatpush1.bf16.msra.mxu0 %v1594_v35  ;;  %v86_v35 = vsub.s32 2, %v1885_v58  ;;  %v1716_v58 = vld [vmem:[#allocation6 + $0x90] sm:$0xff]  }
  0x5f   :  { %885 = vmatprep.subr.bf16.mxu0 %v1601_v37  ;;  %v1658_v37 = vld [vmem:[#allocation4 + $0x1e8] ss:$12 sps:$4 sm:$0xff]  }
  0x62   :  { %886 = vmatpush1.bf16.msra.mxu0 %v1599_v38  ;;  %v1661_v38 = vld [vmem:[#allocation4 + $0x1fc] ss:$12 sps:$4 sm:$0xff]  }
  0x63   :  { %887 = vmatprep.subr.bf16.mxu0 %v1606_v39  ;;  %v1662_v39 = vld [vmem:[#allocation4 + $0x2c0] ss:$12 sps:$4 sm:$0xff]  }
  0x66   :  { %888 = vmatpush1.bf16.msra.mxu0 %v1604_v40  ;;  %v87_v40 = vrot.slane %v1891_v60, %v86_v35  ;;  %v1682_v60 = vld [vmem:[#allocation4 + $0x274] ss:$12 sps:$4 sm:$0xff]  }
  0x67   :  { %889 = vmatprep.subr.bf16.mxu0 %v1611_v41  ;;  %v1659_v41 = vld [vmem:[#allocation4 + $0x1f8] ss:$12 sps:$4 sm:$0xff]  }
  0x6a   :  { %890 = vmatpush1.bf16.msra.mxu0 %v1609_v42  ;;  %v1663_v42 = vld [vmem:[#allocation4 + $0x200] ss:$12 sps:$4 sm:$0xff]  }
  0x6b   :  { %891 = vmatprep.subr.bf16.mxu0 %v1616_v43  ;;  %v1666_v43 = vld [vmem:[#allocation4 + $0x214] ss:$12 sps:$4 sm:$0xff]  }
  0x6e   :  { %892 = vmatpush1.bf16.msra.mxu0 %v1614_v44  ;;  %v1667_v44 = vld [vmem:[#allocation4 + $0x2d8] ss:$12 sps:$4 sm:$0xff]  }
  0x6f   :  { %893 = vmatprep.subr.bf16.mxu0 %v1621_v45 }
  0x72   :  { %894 = vmatpush1.bf16.msra.mxu0 %v1619_v46  ;;  %v1664_v46 = vld [vmem:[#allocation4 + $0x210] ss:$12 sps:$4 sm:$0xff]  }
  0x73   :  { %895 = vmatprep.subr.bf16.mxu0 %v1626_v47  ;;  %v1668_v47 = vld [vmem:[#allocation4 + $0x218] ss:$12 sps:$4 sm:$0xff]  }
  0x76   :  { %896 = vmatpush1.bf16.msra.mxu0 %v1624_v49  ;;  %v1672_v49 = vld [vmem:[#allocation4 + $0x2f0] ss:$12 sps:$4 sm:$0xff]  }
  0x77   :  { %897 = vmatprep.subr.bf16.mxu0 %v1631_v51  ;;  %v1669_v51 = vld [vmem:[#allocation4 + $0x228] ss:$12 sps:$4 sm:$0xff]  }
  0x7a   :  { %898 = vmatpush1.bf16.msra.mxu0 %v1629_v53  ;;  %v1676_v53 = vld [vmem:[#allocation4 + $0x244] ss:$12 sps:$4 sm:$0xff]  }
  0x7b   :  { %908 = vmatprep.subr.bf16.mxu0 %v1636_v55  ;;  %v1674_v55 = vld [vmem:[#allocation4 + $0x240] ss:$12 sps:$4 sm:$0xff]  }
 0x110   :  { %v154_v1 = vpop.f32.mrb[0].mxu0  ;;  %v1902_v7 = vpop.f32.mrb[0].mxu1 }
 0x111   :  { %v155_v3 = vadd.f32 %v154_v1, %v79_v63  ;;  %v156_v4 = vpop.f32.mrb[1].mxu0  ;;  %v197_v10 = vpop.f32.mrb[1].mxu1  ;;  %v196_v45 = vadd.f32 %v1902_v7, %v87_v40  ;;  %v1685_v63 = vld [vmem:[#allocation4 + $0x28c] ss:$12 sps:$4 sm:$0xff]   ;;  %v1688_v1 = vld [vmem:[#allocation4 + $0x2a4] ss:$12 sps:$4 sm:$0xff]  }
 0x112   :  { %v157_v5 = vadd.f32 %v156_v4, %v83_v0  ;;  %v158_v6 = vpop.f32.mrb[2].mxu0  ;;  %v198_v12 = vadd.f32 %v197_v10, %v91_v2  ;;  %v199_v13 = vpop.f32.mrb[2].mxu1  ;;  %v1683_v0 = vld [vmem:[#allocation4 + $0x288] ss:$12 sps:$4 sm:$0xff]   ;;  %v1686_v2 = vld [vmem:[#allocation4 + $0x2a0] ss:$12 sps:$4 sm:$0xff]  }
 0x113   :  { %v202_v8 = vmax.f32 %v155_v3, 0.0  ;;  %v159_v9 = vpop.f32.mrb[3].mxu0  ;;  %v200_v14 = vpop.f32.mrb[3].mxu1  ;;  %v204_v50 = vmax.f32 %v196_v45, 0.0  ;;  %v1691_v3 = vld [vmem:[#allocation4 + $0x2bc] ss:$12 sps:$4 sm:$0xff]  }
 0x114   :  { %v203_v11 = vmax.f32 %v157_v5, 0.0  ;;  %v205_v18 = vmax.f32 %v198_v12, 0.0  ;;  %v1689_v4 = vld [vmem:[#allocation4 + $0x2b8] ss:$12 sps:$4 sm:$0xff]   ;;  %v1694_v5 = vld [vmem:[#allocation4 + $0x2d4] ss:$12 sps:$4 sm:$0xff]  }
 0x115   :  { %v206_v19 = vpack.c.bf16 %v202_v8, %v202_v8  ;;  %v208_v54 = vpack.c.bf16 %v204_v50, %v204_v50  ;;  %v1692_v6 = vld [vmem:[#allocation4 + $0x2d0] ss:$12 sps:$4 sm:$0xff]   ;;  %v1697_v7 = vld [vmem:[#allocation4 + $0x2ec] ss:$12 sps:$4 sm:$0xff]   ;;  %v1695_v8 = vld [vmem:[#allocation4 + $0x2e8] ss:$12 sps:$4 sm:$0xff]  }
 0x116   :  { %v207_v15 = vpack.c.bf16 %v203_v11, %v203_v11  ;;  %v209_v22 = vpack.c.bf16 %v205_v18, %v205_v18  ;;  %v1698_v9 = vld [vmem:[#allocation6 + $0x40] sm:$0xff]   ;;  %v1700_v11 = vld [vmem:[#allocation6 + $0x48] sm:$0xff]   ;;  %v1702_v13 = vld [vmem:[#allocation6 + $0x50] sm:$0xff]  }
 0x117   :  { %v1699_v10 = vld [vmem:[#allocation6] sm:$0xff]   ;;  %v1701_v12 = vld [vmem:[#allocation6 + $0x8] sm:$0xff]   ;;  %v1703_v14 = vld [vmem:[#allocation6 + $0x10] sm:$0xff]  }
 0x118   :  { %899 = vmatprep.mubr.bf16.mxu0 %v207_v15  ;;  %981 = vmatprep.mubr.bf16.mxu1 %v207_v15  ;;  %v1704_v15 = vld [vmem:[#allocation6 + $0x58] sm:$0xff]   ;;  %v1707_v18 = vld [vmem:[#allocation6 + $0x20] sm:$0xff]  }
 0x119   :  { %900 = vmatmul.mubr.bf16.vlgmr.msra.gmra.mrb[4].mxu0 %v206_v19  ;;  %982 = vmatmul.mubr.bf16.vlgmr.msra.gmra.mrb[4].mxu1 %v206_v19  ;;  %v1708_v19 = vld [vmem:[#allocation6 + $0x68] sm:$0xff]  }
 0x11a   :  { %909 = vmatpush1.bf16.msra.mxu0 %v1634_v16  ;;  %1474 = vmatpush3.bf16.msra.mxu1 %v1638_v17  ;;  %v1705_v16 = vld [vmem:[#allocation6 + $0x18] sm:$0xff]   ;;  %v1706_v17 = vld [vmem:[#allocation6 + $0x60] sm:$0xff]  }
 0x11b   :  { %910 = vmatprep.subr.bf16.mxu0 %v1641_v20  ;;  %1475 = vmatprep.subr.bf16.mxu1 %v1642_v21  ;;  %v1709_v20 = vld [vmem:[#allocation6 + $0x28] sm:$0xff]   ;;  %v1710_v21 = vld [vmem:[#allocation6 + $0x70] sm:$0xff]  }
 0x11c   :  { %1021 = vmatprep.mubr.bf16.mxu1 %v209_v22  ;;  %940 = vmatprep.mubr.bf16.mxu0 %v209_v22  ;;  %v1711_v22 = vld [vmem:[#allocation6 + $0x30] sm:$0xff]  }
 0x11e   :  { %911 = vmatpush1.bf16.msra.mxu0 %v1639_v23  ;;  %1476 = vmatpush3.bf16.msra.mxu1 %v1643_v24  ;;  %v1712_v23 = vld [vmem:[#allocation6 + $0x78] sm:$0xff]  }
 0x11f   :  { %912 = vmatprep.subr.bf16.mxu0 %v1646_v25  ;;  %1477 = vmatprep.subr.bf16.mxu1 %v1647_v26  ;;  %v1713_v24 = vld [vmem:[#allocation6 + $0x38] sm:$0xff]   ;;  %v1804_v25 = vmov 0.0  }
 0x122   :  { %913 = vmatpush1.bf16.msra.mxu0 %v1644_v27  ;;  %1478 = vmatpush3.bf16.msra.mxu1 %v1648_v28 }
 0x123   :  { %914 = vmatprep.subr.bf16.mxu0 %v1651_v29  ;;  %1479 = vmatprep.subr.bf16.mxu1 %v1652_v30 }
 0x126   :  { %915 = vmatpush1.bf16.msra.mxu0 %v1649_v31  ;;  %1480 = vmatpush3.bf16.msra.mxu1 %v1653_v32  ;;  %v338_v31 = vld [vmem:[%s1928_s4] sm:$0x7] }
 0x127   :  { %916 = vmatprep.subr.bf16.mxu0 %v1656_v33  ;;  %1481 = vmatprep.subr.bf16.mxu1 %v1657_v34  ;;  %v351_v32 = vrot.slane %v338_v31, %v86_v35 }
 0x12a   :  { %917 = vmatpush1.bf16.msra.mxu0 %v1654_v36  ;;  %1482 = vmatpush3.bf16.msra.mxu1 %v1658_v37 }
 0x12b   :  { %918 = vmatprep.subr.bf16.mxu0 %v1661_v38  ;;  %1483 = vmatprep.subr.bf16.mxu1 %v1662_v39 }
 0x12e   :  { %919 = vmatpush1.bf16.msra.mxu0 %v1659_v41  ;;  %1484 = vmatpush3.bf16.msra.mxu1 %v1663_v42  ;;  %v343_v41 = vrot.slane %v338_v31, %v78_v59  ;;  %v347_v42 = vrot.slane %v338_v31, %v82_v61  ;;  %v1717_v59 = vld [vmem:[#allocation6 + $0x98] sm:$0xff]   ;;  %v1718_v61 = vld [vmem:[#allocation6 + $0xa0] sm:$0xff]  }
 0x12f   :  { %920 = vmatprep.subr.bf16.mxu0 %v1666_v43  ;;  %1485 = vmatprep.subr.bf16.mxu1 %v1667_v44 }
 0x132   :  { %921 = vmatpush1.bf16.msra.mxu0 %v1664_v46  ;;  %1486 = vmatpush3.bf16.msra.mxu1 %v1668_v47 }
 0x133   :  { %922 = vmatprep.subr.bf16.mxu0 %v1671_v48  ;;  %1487 = vmatprep.subr.bf16.mxu1 %v1672_v49 }
 0x136   :  { %923 = vmatpush1.bf16.msra.mxu0 %v1669_v51  ;;  %1488 = vmatpush3.bf16.msra.mxu1 %v1673_v52  ;;  %v1714_v51 = vld [vmem:[#allocation6 + $0x80] sm:$0xff]  }
 0x137   :  { %924 = vmatprep.subr.bf16.mxu0 %v1676_v53  ;;  %1495 = vmatprep.subr.bf16.mxu1 %v1698_v9  ;;  %v1715_v53 = vld [vmem:[#allocation6 + $0x88] sm:$0xff]  }
 0x139   :  { %1022 = vmatmul.mubr.bf16.vlgmr.msra.gmra.mrb[8].mxu1 %v208_v54 }
 0x13a   :  { %925 = vmatpush1.bf16.msra.mxu0 %v1674_v55  ;;  %1496 = vmatpush3.bf16.msra.mxu1 %v1699_v10  ;;  %v1720_v55 = vld [vmem:[#allocation6 + $0xb0] sm:$0xff]  }
 0x13b   :  { %926 = vmatprep.subr.bf16.mxu0 %v1679_v56  ;;  %1497 = vmatprep.subr.bf16.mxu1 %v1700_v11  ;;  %v1721_v56 = vld [vmem:[#allocation6 + $0xb8] sm:$0xff]  }
 0x13e   :  { %927 = vmatpush1.bf16.msra.mxu0 %v1677_v57  ;;  %1498 = vmatpush3.bf16.msra.mxu1 %v1701_v12 }
 0x13f   :  { %928 = vmatprep.subr.bf16.mxu0 %v1682_v60  ;;  %1499 = vmatprep.subr.bf16.mxu1 %v1702_v13 }
 0x142   :  { %929 = vmatpush1.bf16.msra.mxu0 %v1680_v62  ;;  %1500 = vmatpush3.bf16.msra.mxu1 %v1703_v14 }
 0x143   :  { %930 = vmatprep.subr.bf16.mxu0 %v1685_v63  ;;  %1501 = vmatprep.subr.bf16.mxu1 %v1704_v15 }
 0x146   :  { %931 = vmatpush1.bf16.msra.mxu0 %v1683_v0  ;;  %1502 = vmatpush3.bf16.msra.mxu1 %v1705_v16 }
 0x147   :  { %932 = vmatprep.subr.bf16.mxu0 %v1688_v1  ;;  %1503 = vmatprep.subr.bf16.mxu1 %v1706_v17 }
 0x14a   :  { %933 = vmatpush1.bf16.msra.mxu0 %v1686_v2  ;;  %1504 = vmatpush3.bf16.msra.mxu1 %v1707_v18 }
 0x14b   :  { %934 = vmatprep.subr.bf16.mxu0 %v1691_v3  ;;  %1505 = vmatprep.subr.bf16.mxu1 %v1708_v19  ;;  %v1426_v3 = vld [vmem:[%s1930_s6] ss:$0 sm:$0xff] }
 0x14e   :  { %935 = vmatpush1.bf16.msra.mxu0 %v1689_v4  ;;  %1506 = vmatpush3.bf16.msra.mxu1 %v1709_v20 }
 0x14f   :  { %936 = vmatprep.subr.bf16.mxu0 %v1694_v5  ;;  %1507 = vmatprep.subr.bf16.mxu1 %v1710_v21 }
 0x152   :  { %937 = vmatpush1.bf16.msra.mxu0 %v1692_v6  ;;  %1508 = vmatpush3.bf16.msra.mxu1 %v1711_v22 }
 0x153   :  { %938 = vmatprep.subr.bf16.mxu0 %v1697_v7  ;;  %1509 = vmatprep.subr.bf16.mxu1 %v1712_v23 }
 0x156   :  { %939 = vmatpush1.bf16.msra.mxu0 %v1695_v8  ;;  %1510 = vmatpush3.bf16.msra.mxu1 %v1713_v24 }
 0x157   :  { %1526 = vmatprep.subr.bf16.mxu1 %v1804_v25 }
 0x159   :  { %941 = vmatmul.mubr.bf16.vlgmr.msra.gmra.mrb[4].mxu0 %v208_v54  ;;  %v1719_v54 = vld [vmem:[#allocation6 + $0xa8] sm:$0xff]  }
 0x1ec   :  { %v1467_v26 = vpop.f32.mrb[4].mxu1 }
 0x1ed   :  { %v1468_v27 = vpop.f32.mrb[5].mxu1 }
 0x1ee   :  { %v1469_v28 = vadd.f32 %v1468_v27, %v1467_v26  ;;  %v1470_v29 = vpop.f32.mrb[6].mxu1 }
 0x1ef   :  { %v1471_v30 = vpop.f32.mrb[7].mxu1 }
 0x1f0   :  { %v984_v36 = vadd.f32 %v1469_v28, %v351_v32 }
 0x20c   :  { %v1489_v33 = vpop.f32.mrb[8].mxu1 }
 0x20d   :  { %v1490_v34 = vpop.f32.mrb[9].mxu1 }
 0x20e   :  { %v1491_v37 = vadd.f32 %v1490_v34, %v1489_v33  ;;  %v1492_v38 = vpop.f32.mrb[10].mxu1 }
 0x20f   :  { %v1493_v39 = vpop.f32.mrb[11].mxu1 }
 0x210   :  { %v1024_v40 = vadd.f32 %v1491_v37, %v984_v36 }
 0x212   :  { %v1031_v57 = vmax.f32 %v1024_v40, 0.0 }
 0x214   :  { %v1034_v60 = vpack.c.bf16 %v1031_v57, %v1031_v57 }
 0x22c   :  { %v942_v43 = vpop.f32.mrb[4].mxu0 }
 0x22d   :  { %v1546_v44 = vadd.f32 %v942_v43, %v343_v41  ;;  %v944_v45 = vpop.f32.mrb[5].mxu0 }
 0x22e   :  { %v1547_v46 = vadd.f32 %v944_v45, %v347_v42  ;;  %v946_v47 = vpop.f32.mrb[6].mxu0 }
 0x22f   :  { %v1029_v48 = vmax.f32 %v1546_v44, 0.0  ;;  %v947_v35 = vpop.f32.mrb[7].mxu0 }
 0x230   :  { %v1030_v49 = vmax.f32 %v1547_v46, 0.0 }
 0x231   :  { %v1032_v52 = vpack.c.bf16 %v1029_v48, %v1029_v48 }
 0x232   :  { %v1033_v50 = vpack.c.bf16 %v1030_v49, %v1030_v49 }
 0x234   :  { %1266 = vmatprep.mubr.bf16.mxu1 %v1033_v50 }
 0x235   :  { %1267 = vmatmul.mubr.bf16.vlgmr.msra.gmra.mrb[12].mxu1 %v1032_v52 }
 0x236   :  { %1527 = vmatpush3.bf16.msra.mxu1 %v1714_v51  ;;  %1542 = vmatprep.mubr.msk.bf16.mxu1 %vm1805_vm1, %v1804_v25 }
 0x237   :  { %1528 = vmatprep.subr.bf16.mxu1 %v1804_v25 }
 0x23a   :  { %1529 = vmatpush3.bf16.msra.mxu1 %v1715_v53 }
 0x23b   :  { %1530 = vmatprep.subr.bf16.mxu1 %v1804_v25 }
 0x23e   :  { %1531 = vmatpush3.bf16.msra.mxu1 %v1716_v58 }
 0x23f   :  { %1532 = vmatprep.subr.bf16.mxu1 %v1804_v25 }
 0x242   :  { %1533 = vmatpush3.bf16.msra.mxu1 %v1717_v59 }
 0x243   :  { %1534 = vmatprep.subr.bf16.mxu1 %v1804_v25 }
 0x246   :  { %1535 = vmatpush3.bf16.msra.mxu1 %v1718_v61 }
 0x247   :  { %1536 = vmatprep.subr.bf16.mxu1 %v1804_v25 }
 0x24a   :  { %1537 = vmatpush3.bf16.msra.mxu1 %v1719_v54 }
 0x24b   :  { %1538 = vmatprep.subr.bf16.mxu1 %v1804_v25 }
 0x24e   :  { %1539 = vmatpush3.bf16.msra.mxu1 %v1720_v55 }
 0x24f   :  { %1540 = vmatprep.subr.bf16.mxu1 %v1804_v25 }
 0x252   :  { %1541 = vmatpush3.bf16.msra.mxu1 %v1721_v56 }
 0x255   :  { %1543 = vmatmul.mubr.bf16.vlgmr.msra.gmra.mrb[16].mxu1 %v1034_v60 }
 0x308   :  { %v1511_v62 = vpop.f32.mrb[12].mxu1 }
 0x309   :  { %v1512_v63 = vpop.f32.mrb[13].mxu1 }
 0x30a   :  { %v1513_v0 = vadd.f32 %v1512_v63, %v1511_v62  ;;  %v1514_v1 = vpop.f32.mrb[14].mxu1 }
 0x30b   :  { %v1515_v2 = vpop.f32.mrb[15].mxu1 }
 0x30c   :  { %v1269_v4 = vadd.f32 %v1513_v0, %v1426_v3 }
 0x328   :  { %v1308_v5 = vpop.f32.mrb[16].mxu1 }
 0x329   :  { %v1309_v6 = vadd.f32 %v1308_v5, %v1269_v4  ;;  %v1544_v7 = vpop.f32.mrb[17].mxu1 }
 0x32a   :  { %v1311_v8 = vpop.f32.mrb[18].mxu1 }
 0x32b   :  { %1722 = vtanh.f32 %v1309_v6  ;;  %v1545_v9 = vpop.f32.mrb[19].mxu1 }
 0x335   :  { %v1723_v10 = vpop.eup %1722 }
 0x336   :  { %v1315_v11 = vmul.f32 2.0, %v1723_v10 }
 0x338   :  { %v1316_v12 = vpack.c.bf16 %v1315_v11, %v1315_v11 }
 0x33a   :  { %1317 = vst [vmem:[%s1931_s7] sm:$0xf] %v1316_v12 }
 0x33b   :  { %1322 = vsyncpa [#allocation3], 1 }
 0x33c   :  { %1323 = vsyncpa [#allocation5], 1 }

</bundles_post_ra>
